<compile_context>
chip_gen: v5e
topology: v5e:2x2
jax: 0.10.0
libtpu: 0.0.40
codegen_flags: <defaults>
</compile_context>

<pallas_src>
import functools

import jax
import jax.numpy as jnp
from jax import lax
from jax.experimental import pallas as pl
from jax.experimental.pallas import tpu as pltpu

LANE = 128


def _round_up(n, m):
    return ((n + m - 1) // m) * m


def _pad_to(a, shape):
    pads = [(0, t - s) for s, t in zip(a.shape, shape)]
    if all(p == (0, 0) for p in pads):
        return a
    return jnp.pad(a, pads)


def im2col_3x3(x_nchw):
    """NCHW (B,C,H,W) -> patches (B, H*W, 9*C); 3x3 conv, pad=1, stride=1.

    Patch feature order is (kh, kw, c) so the feature axis is lane-contiguous;
    only the small raw input is transposed (NCHW -> NHWC), not the expanded
    patch tensor.
    """
    B, C, H, W = x_nchw.shape
    x = jnp.transpose(x_nchw, (0, 2, 3, 1))                        # NHWC
    xp = jnp.pad(x, ((0, 0), (1, 1), (1, 1), (0, 0)))
    cols = [xp[:, di:di + H, dj:dj + W, :] for di in range(3) for dj in range(3)]
    patches = jnp.concatenate(cols, axis=-1)                       # (B,H,W,9C)
    return patches.reshape(B, H * W, 9 * C)


def _pick_spatial_tiling(S, B, K, vmem_budget_bytes=8 << 20):
    """Pick (tile_s, n_par, n_inner) for the spatial pooling reduction.

    tile_s: largest divisor of S that is a multiple of 16 (bf16 sublane pack,
    so the in-kernel (B,tS,K)->(B*tS,K) reshape stays a zero-copy view) and
    whose double-buffered patch tile fits the VMEM budget.  Prefer an even
    tile count so the reduction can be split over the two v7x TensorCores.
    """
    bytes_per_s = B * K * 2  # one spatial position of the bf16 patch slab
    cands = [t for t in range(16, S + 1, 16)
             if S % t == 0 and 2 * t * bytes_per_s <= vmem_budget_bytes]
    if not cands:
        # Tiny / oddly sized S: single whole-S tile (block dim == full dim is legal).
        return S, 1, 1
    even = [t for t in cands if (S // t) % 2 == 0]
    tile_s = max(even) if even else max(cands)
    n_s = S // tile_s
    n_par = 2 if n_s % 2 == 0 else 1
    return tile_s, n_par, n_s // n_par


# ----------------------------------------------------------------------------
# Kernel 1: backbone = conv-as-matmul + ReLU + global-avg-pool partial sums.
# Grid: (n_par "parallel", n_inner "arbitrary").  Each parallel slice owns a
# resident f32 output block (1, B, Fp) used as the pooled-sum accumulator.
# ----------------------------------------------------------------------------
def backbone_kernel(patches_ref, wc_ref, bc_ref, psum_ref):
    s = pl.program_id(1)

    @pl.when(s == 0)
    def _init():
        psum_ref[...] = jnp.zeros_like(psum_ref)

    B, tS, K = patches_ref.shape
    # One large 2D MXU matmul over B*tile_S rows (bf16 in, f32 accumulate).
    p2d = patches_ref[...].reshape(B * tS, K)
    conv = jnp.dot(p2d, wc_ref[...], preferred_element_type=jnp.float32)
    act = jnp.maximum(conv + bc_ref[...], 0.0)                      # f32 VPU
    # Per-batch partial pooled sum into the resident f32 output block.
    psum_ref[...] += jnp.sum(act.reshape(B, tS, -1), axis=1)


# ----------------------------------------------------------------------------
# Kernel 2 (tiny, single block): combine per-core partial sums -> hooked
# representation, then projector MLP (Linear -> BatchNorm1d -> ReLU -> Linear).
# Runs once; needs the FULL batch in one instance for the BN statistics.
# ----------------------------------------------------------------------------
def projector_kernel(psum_ref, w1_ref, b1_ref, g_ref, bt_ref, w2_ref, b2_ref,
                     out_ref, *, inv_s):
    eps = 1e-5
    rep = jnp.sum(psum_ref[...], axis=0) * inv_s                    # (B, Fp) hooked repr
    z = jnp.dot(rep, w1_ref[...], preferred_element_type=jnp.float32) + b1_ref[...]
    mean = jnp.mean(z, axis=0, keepdims=True)
    var = jnp.mean((z - mean) ** 2, axis=0, keepdims=True)          # biased (PyTorch BN fwd)
    zn = (z - mean) * lax.rsqrt(var + eps) * g_ref[...] + bt_ref[...]
    a = jnp.maximum(zn, 0.0)
    out_ref[...] = (jnp.dot(a, w2_ref[...], preferred_element_type=jnp.float32)
                    + b2_ref[...]).astype(out_ref.dtype)


def netwrapper_forward(x, params):
    """Full NetWrapper.forward: hooked representation -> projector projection."""
    B, C, H, W = x.shape
    # bf16 cast fuses into the im2col write; K stays at its true (un-padded) width.
    patches = im2col_3x3(x).astype(jnp.bfloat16)                    # (B, S, K) bf16
    _, S, K = patches.shape
    F_out = params["wc"].shape[1]
    Hd = params["w1"].shape[1]
    P = params["w2"].shape[1]

    Fp, Hp, Pp = (_round_up(d, LANE) for d in (F_out, Hd, P))
    tile_s, n_par, n_inner = _pick_spatial_tiling(S, B, K)

    # Small resident operands: conv weight/bias lane-padded on the output dim only.
    wc_p = _pad_to(params["wc"], (K, Fp)).astype(jnp.bfloat16)
    bc_p = _pad_to(params["bc"], (1, Fp))
    # Projector params (only used by the tiny second call; stay f32).
    w1_p = _pad_to(params["w1"], (Fp, Hp))
    b1_p = _pad_to(params["b1"], (1, Hp))
    g_p = _pad_to(params["gamma"], (1, Hp))
    bt_p = _pad_to(params["beta"], (1, Hp))
    w2_p = _pad_to(params["w2"], (Hp, Pp))
    b2_p = _pad_to(params["b2"], (1, Pp))

    const2 = lambda p, s: (0, 0)
    psum = pl.pallas_call(
        backbone_kernel,
        out_shape=jax.ShapeDtypeStruct((n_par, B, Fp), jnp.float32),
        grid_spec=pltpu.PrefetchScalarGridSpec(
            num_scalar_prefetch=0,
            grid=(n_par, n_inner),
            in_specs=[
                # patch tiles, true K width, double-buffered by the pipeline
                pl.BlockSpec((B, tile_s, K), lambda p, s: (0, p * n_inner + s, 0)),
                pl.BlockSpec((K, Fp), const2),                      # conv weight (resident)
                pl.BlockSpec((1, Fp), const2),                      # conv bias
            ],
            # Per-parallel-slice pooled-sum accumulator (resident across s).
            out_specs=pl.BlockSpec((None, B, Fp), lambda p, s: (p, 0, 0)),
        ),
        compiler_params=pltpu.CompilerParams(
            dimension_semantics=("parallel", "arbitrary"),
        ),
    )(patches, wc_p, bc_p)

    # Tiny single-block finalize: combine partials + projector MLP (needs the
    # whole batch at once for BatchNorm1d training-mode statistics).
    out = pl.pallas_call(
        functools.partial(projector_kernel, inv_s=1.0 / S),
        out_shape=jax.ShapeDtypeStruct((B, Pp), jnp.float32),
    )(psum, w1_p, b1_p, g_p, bt_p, w2_p, b2_p)
    return out[:, :P]


def reference_forward(x, params):
    """Plain-JAX reference (same bf16-in / f32-accumulate conv as the kernel)."""
    patches = im2col_3x3(x)
    conv = jnp.einsum("bsk,kf->bsf",
                      patches.astype(jnp.bfloat16),
                      params["wc"].astype(jnp.bfloat16),
                      preferred_element_type=jnp.float32) + params["bc"]
    rep = jnp.mean(jnp.maximum(conv, 0.0), axis=1)
    z = rep @ params["w1"] + params["b1"]
    mean = z.mean(0, keepdims=True)
    var = ((z - mean) ** 2).mean(0, keepdims=True)
    zn = (z - mean) / jnp.sqrt(var + 1e-5) * params["gamma"] + params["beta"]
    a = jnp.maximum(zn, 0.0)
    return a @ params["w2"] + params["b2"]


if __name__ == "__main__":
    # Small shapes consistent with the module.
    B, C, H, W = 2, 4, 16, 16          # input batch, NCHW
    F_out = 8                          # backbone conv channels -> hooked hidden dim
    proj_hidden = 32                   # projection_hidden_size
    proj_size = 16                     # projection_size

    key = jax.random.PRNGKey(0)
    ks = jax.random.split(key, 8)
    x = jax.random.normal(ks[0], (B, C, H, W), jnp.float32)

    # Conv2d(C, F, 3) weight (F, C, 3, 3) -> (kh, kw, C, F) -> (9*C, F)
    # to match the (kh, kw, c) patch layout produced by im2col_3x3.
    w_conv = jax.random.normal(ks[1], (F_out, C, 3, 3), jnp.float32) * 0.1
    params = {
        "wc": jnp.transpose(w_conv, (2, 3, 1, 0)).reshape(9 * C, F_out),
        "bc": jax.random.normal(ks[2], (1, F_out), jnp.float32) * 0.1,
        # projector MLP
        "w1": jax.random.normal(ks[4], (F_out, proj_hidden), jnp.float32) * 0.1,
        "b1": jax.random.normal(ks[5], (1, proj_hidden), jnp.float32) * 0.1,
        "gamma": jnp.ones((1, proj_hidden), jnp.float32),
        "beta": jnp.zeros((1, proj_hidden), jnp.float32),
        "w2": jax.random.normal(ks[6], (proj_hidden, proj_size), jnp.float32) * 0.1,
        "b2": jax.random.normal(ks[7], (1, proj_size), jnp.float32) * 0.1,
    }

    out = jax.block_until_ready(jax.jit(netwrapper_forward)(x, params))
    ref = reference_forward(x, params)
    assert out.shape == (B, proj_size)
    assert jnp.allclose(out, ref, atol=1e-3, rtol=1e-3), "mismatch vs reference"
    print("KERNEL_OK")
</pallas_src>

<mosaic_0001>
module attributes {stable_mosaic.version = 11 : i64} {
  func.func @backbone_kernel(%arg0: i32, %arg1: i32, %arg2: memref<2x128x36xbf16, #tpu.memory_space<vmem>>, %arg3: memref<36x128xbf16, #tpu.memory_space<vmem>>, %arg4: memref<1x128xf32, #tpu.memory_space<vmem>>, %arg5: memref<1x2x128xf32, #tpu.memory_space<vmem>>) attributes {dimension_semantics = [#tpu.dimension_semantics<parallel>, #tpu.dimension_semantics<arbitrary>], iteration_bounds = array<i64: 2, 1>, scalar_prefetch = 0 : i64, scratch_operands = 0 : i64, tpu.core_type = #tpu.core_type<tc>, window_params = [{transform_indices = @transform_0, window_bounds = array<i64: 2, 128, 36>}, {pipeline_mode = #tpu.pipeline_mode<synchronous>, transform_indices = @transform_1, window_bounds = array<i64: 36, 128>}, {pipeline_mode = #tpu.pipeline_mode<synchronous>, transform_indices = @transform_2, window_bounds = array<i64: 1, 128>}, {transform_indices = @transform_3, window_bounds = array<i64: 1, 2, 128>}]} {
    %c0_i32 = arith.constant 0 : i32
    %0 = arith.cmpi eq, %arg1, %c0_i32 : i32
    %1 = arith.extui %0 : i1 to i32
    %c0_i32_0 = arith.constant 0 : i32
    %2 = arith.cmpi ne, %1, %c0_i32_0 : i32
    scf.if %2 {
      %cst_15 = arith.constant 0.000000e+00 : f32
      %20 = vector.broadcast %cst_15 : f32 to vector<2x128xf32>
      %c0_16 = arith.constant 0 : index
      %c0_17 = arith.constant 0 : index
      %c0_18 = arith.constant 0 : index
      %21 = vector.load %arg5[%c0_16, %c0_17, %c0_18] : memref<1x2x128xf32, #tpu.memory_space<vmem>>, vector<1x2x128xf32>
      %22 = vector.shape_cast %21 : vector<1x2x128xf32> to vector<2x128xf32>
      %23 = vector.shape_cast %20 : vector<2x128xf32> to vector<1x2x128xf32>
      tpu.vector_store %arg5[%c0_16, %c0_17, %c0_18], %23 {strides = array<i32>} : memref<1x2x128xf32, #tpu.memory_space<vmem>>, vector<1x2x128xf32>,
    } else {
    }
    %c0 = arith.constant 0 : index
    %c0_1 = arith.constant 0 : index
    %c0_2 = arith.constant 0 : index
    %3 = vector.load %arg2[%c0, %c0_1, %c0_2] : memref<2x128x36xbf16, #tpu.memory_space<vmem>>, vector<2x128x36xbf16>
    %4 = vector.shape_cast %3 : vector<2x128x36xbf16> to vector<256x36xbf16>
    %c0_3 = arith.constant 0 : index
    %c0_4 = arith.constant 0 : index
    %5 = vector.load %arg3[%c0_3, %c0_4] : memref<36x128xbf16, #tpu.memory_space<vmem>>, vector<36x128xbf16>
    %cst = arith.constant dense<0.000000e+00> : vector<256x128xf32>
    %6 = tpu.matmul %4, %5, %cst {dimension_numbers = #tpu.dot_dimension_numbers<[1], [0], [0], [1], [0, 0, 1, 1], [], []>} : vector<256x36xbf16>, vector<36x128xbf16>, vector<256x128xf32> -> vector<256x128xf32>
    %c0_5 = arith.constant 0 : index
    %c0_6 = arith.constant 0 : index
    %7 = vector.load %arg4[%c0_5, %c0_6] : memref<1x128xf32, #tpu.memory_space<vmem>>, vector<1x128xf32>
    %8 = vector.broadcast %7 : vector<1x128xf32> to vector<256x128xf32>
    %9 = arith.addf %6, %8 : vector<256x128xf32>
    %cst_7 = arith.constant 0.000000e+00 : f32
    %10 = vector.broadcast %cst_7 : f32 to vector<256x128xf32>
    %11 = arith.maximumf %9, %10 : vector<256x128xf32>
    %c0_8 = arith.constant 0 : index
    %c0_9 = arith.constant 0 : index
    %c0_10 = arith.constant 0 : index
    %12 = vector.load %arg5[%c0_8, %c0_9, %c0_10] : memref<1x2x128xf32, #tpu.memory_space<vmem>>, vector<1x2x128xf32>
    %13 = vector.shape_cast %12 : vector<1x2x128xf32> to vector<2x128xf32>
    %14 = vector.shape_cast %11 : vector<256x128xf32> to vector<2x128x128xf32>
    %cst_11 = arith.constant dense<0.000000e+00> : vector<2x128xf32>
    %15 = vector.multi_reduction <add>, %14, %cst_11 [1] : vector<2x128x128xf32> to vector<2x128xf32>
    %16 = arith.addf %13, %15 : vector<2x128xf32>
    %c0_12 = arith.constant 0 : index
    %c0_13 = arith.constant 0 : index
    %c0_14 = arith.constant 0 : index
    %17 = vector.load %arg5[%c0_12, %c0_13, %c0_14] : memref<1x2x128xf32, #tpu.memory_space<vmem>>, vector<1x2x128xf32>
    %18 = vector.shape_cast %17 : vector<1x2x128xf32> to vector<2x128xf32>
    %19 = vector.shape_cast %16 : vector<2x128xf32> to vector<1x2x128xf32>
    tpu.vector_store %arg5[%c0_12, %c0_13, %c0_14], %19 {strides = array<i32>} : memref<1x2x128xf32, #tpu.memory_space<vmem>>, vector<1x2x128xf32>,
    return
  }
  func.func @transform_0(%arg0: i32, %arg1: i32) -> (i32, i32, i32) {
    %c1_i32 = arith.constant 1 : i32
    %0 = arith.muli %arg0, %c1_i32 : i32
    %1 = arith.addi %0, %arg1 : i32
    %c0_i32 = arith.constant 0 : i32
    %c0_i32_0 = arith.constant 0 : i32
    %c0_i32_1 = arith.constant 0 : i32
    return %c0_i32, %1, %c0_i32_0 : i32, i32, i32
  }
  func.func @transform_1(%arg0: i32, %arg1: i32) -> (i32, i32) {
    %c0_i32 = arith.constant 0 : i32
    %c0_i32_0 = arith.constant 0 : i32
    %c0_i32_1 = arith.constant 0 : i32
    return %c0_i32, %c0_i32_0 : i32, i32
  }
  func.func @transform_2(%arg0: i32, %arg1: i32) -> (i32, i32) {
    %c0_i32 = arith.constant 0 : i32
    %c0_i32_0 = arith.constant 0 : i32
    %c0_i32_1 = arith.constant 0 : i32
    return %c0_i32, %c0_i32_0 : i32, i32
  }
  func.func @transform_3(%arg0: i32, %arg1: i32) -> (i32, i32, i32) {
    %c0_i32 = arith.constant 0 : i32
    %c0_i32_0 = arith.constant 0 : i32
    %c0_i32_1 = arith.constant 0 : i32
    return %arg0, %c0_i32, %c0_i32_0 : i32, i32, i32
  }
}

module attributes {stable_mosaic.version = 11 : i64} {
  func.func @projector_kernel(%arg0: memref<2x2x128xf32, #tpu.memory_space<vmem>>, %arg1: memref<128x128xf32, #tpu.memory_space<vmem>>, %arg2: memref<1x128xf32, #tpu.memory_space<vmem>>, %arg3: memref<1x128xf32, #tpu.memory_space<vmem>>, %arg4: memref<1x128xf32, #tpu.memory_space<vmem>>, %arg5: memref<128x128xf32, #tpu.memory_space<vmem>>, %arg6: memref<1x128xf32, #tpu.memory_space<vmem>>, %arg7: memref<2x128xf32, #tpu.memory_space<vmem>>) attributes {dimension_semantics = [], scalar_prefetch = 0 : i64, scratch_operands = 0 : i64, tpu.core_type = #tpu.core_type<tc>} {
    %c0 = arith.constant 0 : index
    %c0_0 = arith.constant 0 : index
    %c0_1 = arith.constant 0 : index
    %0 = vector.load %arg0[%c0, %c0_0, %c0_1] : memref<2x2x128xf32, #tpu.memory_space<vmem>>, vector<2x2x128xf32>
    %cst = arith.constant dense<0.000000e+00> : vector<2x128xf32>
    %1 = vector.multi_reduction <add>, %0, %cst [0] : vector<2x2x128xf32> to vector<2x128xf32>
    %cst_2 = arith.constant 3.906250e-03 : f32
    %2 = vector.broadcast %cst_2 : f32 to vector<2x128xf32>
    %3 = arith.mulf %1, %2 : vector<2x128xf32>
    %c0_3 = arith.constant 0 : index
    %c0_4 = arith.constant 0 : index
    %4 = vector.load %arg1[%c0_3, %c0_4] : memref<128x128xf32, #tpu.memory_space<vmem>>, vector<128x128xf32>
    %cst_5 = arith.constant dense<0.000000e+00> : vector<2x128xf32>
    %5 = tpu.matmul %3, %4, %cst_5 {dimension_numbers = #tpu.dot_dimension_numbers<[1], [0], [0], [1], [0, 0, 1, 1], [], []>} : vector<2x128xf32>, vector<128x128xf32>, vector<2x128xf32> -> vector<2x128xf32>
    %c0_6 = arith.constant 0 : index
    %c0_7 = arith.constant 0 : index
    %6 = vector.load %arg2[%c0_6, %c0_7] : memref<1x128xf32, #tpu.memory_space<vmem>>, vector<1x128xf32>
    %7 = vector.broadcast %6 : vector<1x128xf32> to vector<2x128xf32>
    %8 = arith.addf %5, %7 : vector<2x128xf32>
    %cst_8 = arith.constant dense<0.000000e+00> : vector<128xf32>
    %9 = vector.multi_reduction <add>, %8, %cst_8 [0] : vector<2x128xf32> to vector<128xf32>
    %10 = vector.shape_cast %9 : vector<128xf32> to vector<1x128xf32>
    %cst_9 = arith.constant 2.000000e+00 : f32
    %11 = vector.broadcast %cst_9 : f32 to vector<1x128xf32>
    %12 = arith.divf %10, %11 : vector<1x128xf32>
    %13 = vector.broadcast %12 : vector<1x128xf32> to vector<2x128xf32>
    %14 = arith.subf %8, %13 : vector<2x128xf32>
    %15 = arith.mulf %14, %14 : vector<2x128xf32>
    %cst_10 = arith.constant dense<0.000000e+00> : vector<128xf32>
    %16 = vector.multi_reduction <add>, %15, %cst_10 [0] : vector<2x128xf32> to vector<128xf32>
    %17 = vector.shape_cast %16 : vector<128xf32> to vector<1x128xf32>
    %cst_11 = arith.constant 2.000000e+00 : f32
    %18 = vector.broadcast %cst_11 : f32 to vector<1x128xf32>
    %19 = arith.divf %17, %18 : vector<1x128xf32>
    %20 = vector.broadcast %12 : vector<1x128xf32> to vector<2x128xf32>
    %21 = arith.subf %8, %20 : vector<2x128xf32>
    %cst_12 = arith.constant 9.99999974E-6 : f32
    %22 = vector.broadcast %cst_12 : f32 to vector<1x128xf32>
    %23 = arith.addf %19, %22 : vector<1x128xf32>
    %24 = math.rsqrt %23 : vector<1x128xf32>
    %25 = vector.broadcast %24 : vector<1x128xf32> to vector<2x128xf32>
    %26 = arith.mulf %21, %25 : vector<2x128xf32>
    %c0_13 = arith.constant 0 : index
    %c0_14 = arith.constant 0 : index
    %27 = vector.load %arg3[%c0_13, %c0_14] : memref<1x128xf32, #tpu.memory_space<vmem>>, vector<1x128xf32>
    %28 = vector.broadcast %27 : vector<1x128xf32> to vector<2x128xf32>
    %29 = arith.mulf %26, %28 : vector<2x128xf32>
    %c0_15 = arith.constant 0 : index
    %c0_16 = arith.constant 0 : index
    %30 = vector.load %arg4[%c0_15, %c0_16] : memref<1x128xf32, #tpu.memory_space<vmem>>, vector<1x128xf32>
    %31 = vector.broadcast %30 : vector<1x128xf32> to vector<2x128xf32>
    %32 = arith.addf %29, %31 : vector<2x128xf32>
    %cst_17 = arith.constant 0.000000e+00 : f32
    %33 = vector.broadcast %cst_17 : f32 to vector<2x128xf32>
    %34 = arith.maximumf %32, %33 : vector<2x128xf32>
    %c0_18 = arith.constant 0 : index
    %c0_19 = arith.constant 0 : index
    %35 = vector.load %arg5[%c0_18, %c0_19] : memref<128x128xf32, #tpu.memory_space<vmem>>, vector<128x128xf32>
    %cst_20 = arith.constant dense<0.000000e+00> : vector<2x128xf32>
    %36 = tpu.matmul %34, %35, %cst_20 {dimension_numbers = #tpu.dot_dimension_numbers<[1], [0], [0], [1], [0, 0, 1, 1], [], []>} : vector<2x128xf32>, vector<128x128xf32>, vector<2x128xf32> -> vector<2x128xf32>
    %c0_21 = arith.constant 0 : index
    %c0_22 = arith.constant 0 : index
    %37 = vector.load %arg6[%c0_21, %c0_22] : memref<1x128xf32, #tpu.memory_space<vmem>>, vector<1x128xf32>
    %38 = vector.broadcast %37 : vector<1x128xf32> to vector<2x128xf32>
    %39 = arith.addf %36, %38 : vector<2x128xf32>
    %c0_23 = arith.constant 0 : index
    %c0_24 = arith.constant 0 : index
    %40 = vector.load %arg7[%c0_23, %c0_24] : memref<2x128xf32, #tpu.memory_space<vmem>>, vector<2x128xf32>
    tpu.vector_store %arg7[%c0_23, %c0_24], %39 {strides = array<i32>} : memref<2x128xf32, #tpu.memory_space<vmem>>, vector<2x128xf32>,
    return
  }
}

</mosaic_0001>

<bundles_post_ra>
// kernel: netwrapper_forward.3
= control target key start
LH: loop header
LB: loop body
LE: loop exit
PB: predicated region body
PF: predicated region fallthrough
CT: control target
= control target key end

     0   :  { %s378_s0 = inlined_call_operand.vmem [shape: f32[2,2,128], index: 0, kind: input, shape index: {}]   ;;  %s379_s1 = inlined_call_operand.vmem [shape: f32[128,128], index: 1, kind: input, shape index: {}]   ;;  %s380_s2 = inlined_call_operand.vmem [shape: f32[1,128], index: 2, kind: input, shape index: {}]   ;;  %s381_s3 = inlined_call_operand.vmem [shape: f32[1,128], index: 3, kind: input, shape index: {}]   ;;  %s382_s4 = inlined_call_operand.vmem [shape: f32[1,128], index: 4, kind: input, shape index: {}]   ;;  %s383_s5 = inlined_call_operand.vmem [shape: f32[128,128], index: 5, kind: input, shape index: {}]   ;;  %s384_s6 = inlined_call_operand.vmem [shape: f32[1,128], index: 6, kind: input, shape index: {}]   ;;  %s385_s7 = inlined_call_operand.hbm [shape: f32[2,128], index: 7, kind: output, shape index: {}]  }
   0x1   :  { %v49_v0 = vld [vmem:[%s379_s1 + $0x78] sm:$0xff]  ;;  %v48_v1 = vld [vmem:[%s379_s1 + $0x70] sm:$0xff]  ;;  %v47_v2 = vld [vmem:[%s379_s1 + $0x68] sm:$0xff] }
   0x2   :  { %54 = vmatpush.msra.mxu0 %v49_v0  ;;  %v46_v3 = vld [vmem:[%s379_s1 + $0x60] sm:$0xff]  ;;  %v45_v4 = vld [vmem:[%s379_s1 + $0x58] sm:$0xff]  ;;  %v44_v5 = vld [vmem:[%s379_s1 + $0x50] sm:$0xff] }
   0x4   :  { %55 = vmatpush.msra.mxu0 %v48_v1 }
   0x6   :  { %56 = vmatpush.msra.mxu0 %v47_v2 }
   0x8   :  { %57 = vmatpush.msra.mxu0 %v46_v3 }
   0x9   :  { %12 = vsyncpa [#allocation3], 0  ;;  %v43_v6 = vld [vmem:[%s379_s1 + $0x48] sm:$0xff]  ;;  %v42_v7 = vld [vmem:[%s379_s1 + $0x40] sm:$0xff]  ;;  %vm29_vm0 = vcmask 1041408   ;;  %v215_v22 = vmov 2.0  }
   0xa   :  { %58 = vmatpush.msra.mxu0 %v45_v4  ;;  %v41_v8 = vld [vmem:[%s379_s1 + $0x38] sm:$0xff]  ;;  %v40_v9 = vld [vmem:[%s379_s1 + $0x30] sm:$0xff]  ;;  %v39_v10 = vld [vmem:[%s379_s1 + $0x28] sm:$0xff]  ;;  %185 = vrcp.f32 %v215_v22  ;;  %s216_s24 = smov [#allocation2]  }
   0xb   :  { %v27_v11 = vld [vmem:[%s378_s0] sm:$0x3]  ;;  %v28_v12 = vld [vmem:[%s378_s0 + $0x2] sm:$0x3]  ;;  %v37_v16 = vld [vmem:[%s379_s1 + $0x18] sm:$0xff]  ;;  %s168_s25 = sshll.u32 %s216_s24, 4  ;;  %s169_s25 = int_to_ptr.vmem [resolvable:$true] %s168_s25 }
   0xc   :  { %59 = vmatpush.msra.mxu0 %v44_v5  ;;  %v38_v13 = vld [vmem:[%s379_s1 + $0x20] sm:$0xff]  ;;  %v30_v14 = vsel %vm29_vm0, %v27_v11, 0.0  ;;  %v31_v15 = vsel %vm29_vm0, %v28_v12, 0.0  ;;  %v36_v17 = vld [vmem:[%s379_s1 + $0x10] sm:$0xff]  ;;  %v35_v19 = vld [vmem:[%s379_s1 + $0x8] sm:$0xff] }
   0xd   :  { %v32_v18 = vadd.f32 %v31_v15, %v30_v14  ;;  %v34_v20 = vld [vmem:[%s379_s1] sm:$0xff]  ;;  %v137_v29 = vld [vmem:[%s383_s5 + $0x78] sm:$0xff]  ;;  %v136_v31 = vld [vmem:[%s383_s5 + $0x70] sm:$0xff] }
   0xe   :  { %60 = vmatpush.msra.mxu0 %v43_v6  ;;  %v181_v24 = vld [vmem:[%s380_s2] ss:$0 sm:$0xff]  ;;  %142 = vmatpush.msra.mxu1 %v137_v29  ;;  %v135_v34 = vld [vmem:[%s383_s5 + $0x68] sm:$0xff]  ;;  %v133_v39 = vld [vmem:[%s383_s5 + $0x58] sm:$0xff] }
   0xf   :  { %v33_v21 = vmul.f32 0.00390625, %v32_v18  ;;  %v134_v36 = vld [vmem:[%s383_s5 + $0x60] sm:$0xff]  ;;  %v132_v41 = vld [vmem:[%s383_s5 + $0x50] sm:$0xff]  ;;  %v131_v44 = vld [vmem:[%s383_s5 + $0x48] sm:$0xff] }
  0x10   :  { %61 = vmatpush.msra.mxu0 %v42_v7  ;;  %v186_v23 = vpop.eup %185  ;;  %143 = vmatpush.msra.mxu1 %v136_v31  ;;  %v130_v46 = vld [vmem:[%s383_s5 + $0x40] sm:$0xff]  ;;  %v129_v48 = vld [vmem:[%s383_s5 + $0x38] sm:$0xff]  ;;  %v128_v50 = vld [vmem:[%s383_s5 + $0x30] sm:$0xff] }
  0x11   :  { %v82_v25 = vmul.f32 2.0, %v186_v23  ;;  %vm86_vm1 = vweird.f32 %v186_v23  ;;  %v127_v52 = vld [vmem:[%s383_s5 + $0x28] sm:$0xff]  ;;  %v126_v55 = vld [vmem:[%s383_s5 + $0x20] sm:$0xff]  ;;  %v125_v57 = vld [vmem:[%s383_s5 + $0x18] sm:$0xff] }
  0x12   :  { %62 = vmatpush.msra.mxu0 %v41_v8  ;;  %144 = vmatpush.msra.mxu1 %v135_v34  ;;  %v124_v58 = vld [vmem:[%s383_s5 + $0x10] sm:$0xff]  ;;  %v123_v60 = vld [vmem:[%s383_s5 + $0x8] sm:$0xff]  ;;  %v122_v62 = vld [vmem:[%s383_s5] sm:$0xff] }
  0x13   :  { %v83_v28 = vsub.f32 1.0, %v82_v25  ;;  %v183_v12 = vld [vmem:[%s382_s4] ss:$0 sm:$0xff] }
  0x14   :  { %63 = vmatpush.msra.mxu0 %v40_v9  ;;  %145 = vmatpush.msra.mxu1 %v134_v36  ;;  %v182_v9 = vld [vmem:[%s381_s3] ss:$0 sm:$0xff]  ;;  %s170_s3 = sshll.u32 %s385_s7, 4  ;;  %s171_s3 = int_to_ptr.hbm [resolvable:$true] %s170_s3 }
  0x15   :  { %v84_v33 = vmul.f32 %v186_v23, %v83_v28 }
  0x16   :  { %64 = vmatpush.msra.mxu0 %v39_v10  ;;  %146 = vmatpush.msra.mxu1 %v133_v39 }
  0x17   :  { %v85_v38 = vadd.f32 %v186_v23, %v84_v33 }
  0x18   :  { %65 = vmatpush.msra.mxu0 %v38_v13  ;;  %147 = vmatpush.msra.mxu1 %v132_v41 }
  0x19   :  { %v87_v43 = vsel %vm86_vm1, %v186_v23, %v85_v38 }
  0x1a   :  { %66 = vmatpush.msra.mxu0 %v37_v16  ;;  %148 = vmatpush.msra.mxu1 %v131_v44  ;;  %v184_v16 = vld [vmem:[%s384_s6] ss:$0 sm:$0xff] }
  0x1c   :  { %67 = vmatpush.msra.mxu0 %v36_v17  ;;  %149 = vmatpush.msra.mxu1 %v130_v46 }
  0x1e   :  { %68 = vmatpush.msra.mxu0 %v35_v19  ;;  %150 = vmatpush.msra.mxu1 %v129_v48 }
  0x20   :  { %69 = vmatpush.msra.mxu0 %v34_v20  ;;  %151 = vmatpush.msra.mxu1 %v128_v50 }
  0x21   :  { %70 = vmatmul.f32.vlgmr.msra.gmra.mxu0 %v33_v21 }
  0x22   :  { %152 = vmatpush.msra.mxu1 %v127_v52 }
  0x24   :  { %153 = vmatpush.msra.mxu1 %v126_v55 }
  0x26   :  { %154 = vmatpush.msra.mxu1 %v125_v57 }
  0x28   :  { %155 = vmatpush.msra.mxu1 %v124_v58 }
  0x2a   :  { %156 = vmatpush.msra.mxu1 %v123_v60 }
  0x2c   :  { %157 = vmatpush.msra.mxu1 %v122_v62 }
  0x9e   :  { %v71_v26 = vpop.f32.mrf.mxu0 }
  0x9f   :  { %v72_v27 = vadd.f32 %v181_v24, %v71_v26 }
  0xa1   :  { %v74_v30 = vsel %vm29_vm0, %v72_v27, 0.0 }
  0xa2   :  { %v75_v32 = vrot.slane %v74_v30, 4 }
  0xa4   :  { %v76_v35 = vadd.f32 %v75_v32, %v74_v30 }
  0xa6   :  { %v77_v37 = vrot.slane %v76_v35, 2 }
  0xa8   :  { %v78_v40 = vadd.f32 %v77_v37, %v76_v35 }
  0xaa   :  { %v79_v42 = vrot.slane %v78_v40, 1 }
  0xac   :  { %v80_v45 = vadd.f32 %v79_v42, %v78_v40 }
  0xae   :  { %v88_v47 = vmul.f32 %v87_v43, %v80_v45 }
  0xb0   :  { %v89_v49 = vsub.f32 %v72_v27, %v88_v47 }
  0xb2   :  { %v90_v51 = vmul.f32 %v89_v49, %v89_v49 }
  0xb4   :  { %v91_v53 = vsel %vm29_vm0, %v90_v51, 0.0 }
  0xb5   :  { %v92_v54 = vrot.slane %v91_v53, 4 }
  0xb7   :  { %v93_v56 = vadd.f32 %v92_v54, %v91_v53 }
  0xb9   :  { %v94_v59 = vrot.slane %v93_v56, 2 }
  0xbb   :  { %v95_v61 = vadd.f32 %v94_v59, %v93_v56 }
  0xbd   :  { %v96_v63 = vrot.slane %v95_v61, 1 }
  0xbf   :  { %v97_v0 = vadd.f32 %v96_v63, %v95_v61 }
  0xc1   :  { %v98_v1 = vmul.f32 %v97_v0, %v87_v43 }
  0xc3   :  { %v99_v2 = vadd.f32 1e-05, %v98_v1 }
  0xc5   :  { %187 = vrsqrt.f32 %v99_v2  ;;  %vm106_vm3 = vweird.f32 %v99_v2 }
  0xcb   :  { %v188_v3 = vpop.eup %187 }
  0xcc   :  { %v101_v4 = vmul.f32 %v188_v3, %v99_v2  ;;  %vm107_vm2 = vweird.f32 %v188_v3 }
  0xcd   :  { %vm108_vm4 = vmor %vm106_vm3, %vm107_vm2 }
  0xce   :  { %v102_v5 = vmul.f32 %v188_v3, %v101_v4 }
  0xd0   :  { %v103_v6 = vmul.f32 0.5, %v102_v5 }
  0xd2   :  { %v104_v7 = vsub.f32 1.5, %v103_v6 }
  0xd4   :  { %v105_v8 = vmul.f32 %v188_v3, %v104_v7 }
  0xd6   :  { %v109_v10 = vsel %vm108_vm4, %v188_v3, %v105_v8 }
  0xd7   :  { %v110_v11 = vmul.f32 %v109_v10, %v89_v49 }
  0xd9   :  { %v115_v13 = vmul.f32 %v182_v9, %v110_v11 }
  0xdb   :  { %v120_v14 = vadd.f32 %v183_v12, %v115_v13 }
  0xdd   :  { %v121_v15 = vmax.f32 %v120_v14, 0.0 }
  0xdf   :  { %158 = vmatmul.f32.vlgmr.msra.gmra.mxu1 %v121_v15 }
 0x15c   :  { %v159_v17 = vpop.f32.mrf.mxu1 }
 0x15d   :  { %v160_v18 = vadd.f32 %v184_v16, %v159_v17 }
 0x15f   :  { %162 = vst [vmem:[#allocation2] sm:$0x3] %v160_v18 }
 0x160   :  { %173 = dma.vmem_to_hbm [thread:$0]  %s169_s25, 32, %s171_s3, [#allocation3]  }
 0x161   :  { %213 = dma.done.wait [#allocation3], 32  }
 0x162   :  { %214 = vsyncadd [#allocation3], 4294967264 }
 0x163   :  { %178 = vsyncpa [#allocation3], 1 }

// kernel: netwrapper_forward.2
= control target key start
LH: loop header
LB: loop body
LE: loop exit
PB: predicated region body
PF: predicated region fallthrough
CT: control target
= control target key end

     0   :  { %s1019_s12 = smov 0   ;;  %s1021_s13 = smov 0   ;;  %s1212_s0 = inlined_call_operand.vmem [shape: bf16[2,256,36], index: 0, kind: input, shape index: {}]   ;;  %s1213_s1 = inlined_call_operand.vmem [shape: bf16[36,128], index: 1, kind: input, shape index: {}]   ;;  %s1214_s2 = inlined_call_operand.vmem [shape: f32[1,128], index: 2, kind: input, shape index: {}]   ;;  %s1215_s3 = inlined_call_operand.vmem [shape: f32[2,2,128], index: 3, kind: output, shape index: {}]  }
   0x1   :  { %s1023_s14 = smov 0   ;;  %s1025_s15 = smov 0  }
   0x2   :  { %s1027_s16 = smov 0  }
   0x3 LB: > { %s25_s17 = sadd.s32 1, %s992_s15  ;;  %p41_p1 = scmp.ne.s32.totalorder %s984_s13, %s980_s12  ;;  %s996_s16 = sphi %s1027_s16, %s13_s16   ;;  %s992_s15 = sphi %s1025_s15, %s1219_s15   ;;  %s988_s14 = sphi %s1023_s14, %s1218_s14   ;;  %s984_s13 = sphi %s1021_s13, %s1217_s13   ;;  %s980_s12 = sphi %s1019_s12, %s1216_s12  }
   0x4   : > { %p27_p0 = scmp.ge.s32.totalorder %s25_s17, 2  ;;  %p42_p2 = scmp.eq.s32.totalorder %s996_s16, 0 }
   0x5   : > { %s34_s19 = sadd.s32 1, %s984_s13  ;;  %p791_p5 = scmp.ge.s32.totalorder %s996_s16, 2 }
   0x6   : > { %s1221_s17 = smov (%p27_p0, %s25_s17), 0  ;;  %p43_p3 = por %p42_p2, %p41_p1 }
   0x7   : > { %s31_s18 = ssub.s32 %s992_s15, %s1221_s17  ;;  %141 = sbr.rel (%p791_p5) target bundleno = 32 (0x20), region = 24 }
   0x8   : > { %p32_p4 = scmp.eq.s32.totalorder %s31_s18, 0 }
   0xa   : > { %s1054_s20 = scalar_select %p32_p4, %s984_s13, %s34_s19  }
   0xc   : > { %144 = sbr.rel (!%p43_p3) target bundleno = 32 (0x20), region = 28  ;;  %s146_s21 = sand.u32 (%p43_p3), 1, %s984_s13  }
   0xd   : > { %s888_s22 = sshll.u32 (%p43_p3), %s992_s15, 6  ;;  %s792_s23 = sshll.u32 (%p43_p3), %s146_s21, 7 }
   0xe   : > { %s1062_s26 = scalar_lea.vmem (%p43_p3), %s1212_s0, %s888_s22  ;;  %s148_s27 = scalar_lea.vmem (%p43_p3), [#allocation2], %s792_s23 }
   0xf   : > { %v169_v0 = vld [vmem:[%s1062_s26] sm:$0xff] (%p43_p3)   ;;  %v173_v1 = vld [vmem:[%s1062_s26 + $0x8] sm:$0xff] (%p43_p3)   ;;  %v177_v2 = vld [vmem:[%s1062_s26 + $0x10] sm:$0xff] (%p43_p3)  }
  0x10   : > { %170 = vst [vmem:[%s148_s27] sm:$0xff] (%p43_p3), %v169_v0   ;;  %v181_v3 = vld [vmem:[%s1062_s26 + $0x18] sm:$0xff] (%p43_p3)   ;;  %v185_v4 = vld [vmem:[%s1062_s26 + $0x20] sm:$0xff] (%p43_p3)   ;;  %v189_v5 = vld [vmem:[%s1062_s26 + $0x28] sm:$0xff] (%p43_p3)  }
  0x11   : > { %174 = vst [vmem:[%s148_s27 + $0x8] sm:$0xff] %v173_v1   ;;  %v193_v6 = vld [vmem:[%s1062_s26 + $0x30] sm:$0xff]   ;;  %v197_v7 = vld [vmem:[%s1062_s26 + $0x38] sm:$0xff]   ;;  %v201_v8 = vld [vmem:[%s1062_s26 + $0x80] sm:$0xff]  }
  0x12   : > { %178 = vst [vmem:[%s148_s27 + $0x10] sm:$0xff] %v177_v2   ;;  %v205_v9 = vld [vmem:[%s1062_s26 + $0x88] sm:$0xff]   ;;  %v209_v10 = vld [vmem:[%s1062_s26 + $0x90] sm:$0xff]   ;;  %v213_v11 = vld [vmem:[%s1062_s26 + $0x98] sm:$0xff]  }
  0x13   : > { %182 = vst [vmem:[%s148_s27 + $0x18] sm:$0xff] %v181_v3   ;;  %v217_v12 = vld [vmem:[%s1062_s26 + $0xa0] sm:$0xff]   ;;  %v221_v13 = vld [vmem:[%s1062_s26 + $0xa8] sm:$0xff]   ;;  %v225_v14 = vld [vmem:[%s1062_s26 + $0xb0] sm:$0xff]  }
  0x14   : > { %186 = vst [vmem:[%s148_s27 + $0x20] sm:$0xff] %v185_v4   ;;  %v229_v15 = vld [vmem:[%s1062_s26 + $0xb8] sm:$0xff]  }
  0x15   : > { %190 = vst [vmem:[%s148_s27 + $0x28] sm:$0xff] %v189_v5  }
  0x16   : > { %194 = vst [vmem:[%s148_s27 + $0x30] sm:$0xff] %v193_v6  }
  0x17   : > { %198 = vst [vmem:[%s148_s27 + $0x38] sm:$0xff] %v197_v7  }
  0x18   : > { %202 = vst [vmem:[%s148_s27 + $0x40] sm:$0xff] %v201_v8  }
  0x19   : > { %206 = vst [vmem:[%s148_s27 + $0x48] sm:$0xff] %v205_v9  }
  0x1a   : > { %210 = vst [vmem:[%s148_s27 + $0x50] sm:$0xff] %v209_v10  }
  0x1b   : > { %214 = vst [vmem:[%s148_s27 + $0x58] sm:$0xff] %v213_v11  }
  0x1c   : > { %218 = vst [vmem:[%s148_s27 + $0x60] sm:$0xff] %v217_v12  }
  0x1d   : > { %222 = vst [vmem:[%s148_s27 + $0x68] sm:$0xff] %v221_v13  }
  0x1e   : > { %226 = vst [vmem:[%s148_s27 + $0x70] sm:$0xff] %v225_v14  }
  0x1f   : > { %230 = vst [vmem:[%s148_s27 + $0x78] sm:$0xff] %v229_v15  }
  0x20 PF: > { %p795_p6 = scmp.ge.s32.totalorder %s996_s16, 1  ;;  %p319_p7 = scmp.lt.s32.totalorder %s996_s16, 3 }
  0x22   : > { %p320_p8 = pnand %p795_p6, %p319_p7 }
  0x23   : > { %s326_s30 = sand.u32 (!%p320_p8), 1, %s980_s12   ;;  %p350_p9 = scmp.lt.s32.totalorder (!%p320_p8), %s988_s14, 1 }
  0x24   : > { %323 = sbr.rel (%p320_p8) target bundleno = 284 (0x11c), region = 69  ;;  %s796_s6 = sshll.u32 (!%p320_p8), %s326_s30, 7 }
  0x25   : > { %s1092_s9 = scalar_lea.vmem (!%p320_p8), [#allocation2], %s796_s6 }
  0x29   : > { %v396_v16 = vld [vmem:[%s1213_s1 + $0x10] sm:$0x3]  ;;  %vm545_vm0 = vcmask 1041408   ;;  %v906_v20 = vld [vmem:[%s1213_s1 + $0x8] sm:$0xff]  ;;  %v905_v21 = vld [vmem:[%s1213_s1] sm:$0xff]  ;;  %vm496_vm1 = vcmask 293888  }
  0x2a   : > { %v490_v17 = vunpack.c.l.b16 %v396_v16  ;;  %v889_v22 = vld [vmem:[%s1092_s9] sm:$0xff]  ;;  %v890_v26 = vld [vmem:[%s1092_s9 + $0x8] sm:$0xff]  ;;  %v891_v30 = vld [vmem:[%s1092_s9 + $0x10] sm:$0xff]  ;;  %s1223_s14 = smov (!%p350_p9, %s988_s14), 1  ;;  %vm715_vm2 = vcmask 1041409  }
  0x2b   : > { %v897_v23 = vld [vmem:[%s1092_s9 + $0x40] sm:$0xff]  ;;  %v898_v27 = vld [vmem:[%s1092_s9 + $0x48] sm:$0xff]  ;;  %v899_v31 = vld [vmem:[%s1092_s9 + $0x50] sm:$0xff]  ;;  %s797_s12 = sshll.u32 %s1223_s14, 1 }
  0x2c   : > { %v493_v18 = vpack.c.b16 %v490_v17, %v490_v17  ;;  %v901_v24 = vld [vmem:[%s1092_s9 + $0x60] sm:$0xff]  ;;  %v902_v28 = vld [vmem:[%s1092_s9 + $0x68] sm:$0xff]  ;;  %v903_v32 = vld [vmem:[%s1092_s9 + $0x70] sm:$0xff]  ;;  %s1165_s21 = scalar_lea.vmem %s1215_s3, %s797_s12 }
  0x2d   : > { %v893_v25 = vld [vmem:[%s1092_s9 + $0x20] sm:$0xff]  ;;  %v894_v29 = vld [vmem:[%s1092_s9 + $0x28] sm:$0xff]  ;;  %v895_v33 = vld [vmem:[%s1092_s9 + $0x30] sm:$0xff] }
  0x2e   : > { %v547_v19 = vsel %vm545_vm0, %v493_v18, 0  ;;  %v892_v34 = vld [vmem:[%s1092_s9 + $0x18] sm:$0xff]  ;;  %v1143_v57 = vld [vmem:[%s1214_s2] ss:$0 sm:$0xff] }
  0x2f   : > { %554 = vmatpush.bf16.msra.mxu0 %v547_v19  ;;  %908 = vmatpush.bf16.msra.mxu2 %v547_v19  ;;  %v900_v35 = vld [vmem:[%s1092_s9 + $0x58] sm:$0xff] }
  0x30   : > { %909 = vmatpush.bf16.msra.mxu3 %v547_v19  ;;  %907 = vmatpush.bf16.msra.mxu1 %v547_v19  ;;  %v904_v36 = vld [vmem:[%s1092_s9 + $0x78] sm:$0xff] }
  0x31   : > { %v896_v37 = vld [vmem:[%s1092_s9 + $0x38] sm:$0xff] }
  0x33   : > { %555 = vmatpush.bf16.msra.mxu0 %v906_v20  ;;  %911 = vmatpush.bf16.msra.mxu2 %v906_v20 }
  0x34   : > { %912 = vmatpush.bf16.msra.mxu3 %v906_v20  ;;  %910 = vmatpush.bf16.msra.mxu1 %v906_v20 }
  0x37   : > { %556 = vmatpush.bf16.msra.mxu0 %v905_v21  ;;  %914 = vmatpush.bf16.msra.mxu2 %v905_v21 }
  0x38   : > { %915 = vmatpush.bf16.msra.mxu3 %v905_v21  ;;  %913 = vmatpush.bf16.msra.mxu1 %v905_v21 }
  0x3a   : > { %870 = vmatmul.msk.bf16.vlgmr.msra.gmra.mxu0 %vm496_vm1, %v889_v22  ;;  %878 = vmatmul.msk.bf16.vlgmr.msra.gmra.mxu2 %vm496_vm1, %v897_v23 }
  0x3b   : > { %882 = vmatmul.msk.bf16.vlgmr.msra.gmra.mxu3 %vm496_vm1, %v901_v24  ;;  %874 = vmatmul.msk.bf16.vlgmr.msra.gmra.mxu1 %vm496_vm1, %v893_v25 }
  0x4a   : > { %871 = vmatmul.msk.bf16.gmra.mxu0 %vm496_vm1, %v890_v26  ;;  %879 = vmatmul.msk.bf16.gmra.mxu2 %vm496_vm1, %v898_v27 }
  0x4b   : > { %883 = vmatmul.msk.bf16.gmra.mxu3 %vm496_vm1, %v902_v28  ;;  %875 = vmatmul.msk.bf16.gmra.mxu1 %vm496_vm1, %v894_v29 }
  0x5a   : > { %872 = vmatmul.msk.bf16.gmra.mxu0 %vm496_vm1, %v891_v30  ;;  %880 = vmatmul.msk.bf16.gmra.mxu2 %vm496_vm1, %v899_v31 }
  0x5b   : > { %884 = vmatmul.msk.bf16.gmra.mxu3 %vm496_vm1, %v903_v32  ;;  %876 = vmatmul.msk.bf16.gmra.mxu1 %vm496_vm1, %v895_v33 }
  0x6a   : > { %873 = vmatmul.msk.bf16.gmra.mxu0 %vm496_vm1, %v892_v34  ;;  %881 = vmatmul.msk.bf16.gmra.mxu2 %vm496_vm1, %v900_v35 }
  0x6b   : > { %885 = vmatmul.msk.bf16.gmra.mxu3 %vm496_vm1, %v904_v36  ;;  %877 = vmatmul.msk.bf16.gmra.mxu1 %vm496_vm1, %v896_v37 }
  0xb7   : > { %v558_v38 = vpop.f32.mrf.mxu0 }
  0xb8   : > { %v578_v39 = vpop.f32.mrf.mxu1  ;;  %v559_v60 = vadd.f32 %v1143_v57, %v558_v38 }
  0xb9   : > { %v579_v30 = vadd.f32 %v1143_v57, %v578_v39 }
  0xba   : > { %v638_v3 = vmax.f32 %v559_v60, 0.0 }
  0xbd   : > { %v598_v40 = vpop.f32.mrf.mxu2 }
  0xbe   : > { %v1126_v41 = vpop.f32.mrf.mxu3  ;;  %v599_v6 = vadd.f32 %v1143_v57, %v598_v40  ;;  %v998_v40 = vmov 0.0  }
  0xbf   : > { %v560_v42 = vpop.f32.mrf.mxu0  ;;  %359 = vst [vmem:[%s1165_s21] sm:$0x3] %v998_v40 }
  0xc0   : > { %v580_v43 = vpop.f32.mrf.mxu1  ;;  %v561_v59 = vadd.f32 %v1143_v57, %v560_v42  ;;  %v654_v18 = vmax.f32 %v599_v6, 0.0 }
  0xc1   : > { %v581_v37 = vadd.f32 %v1143_v57, %v580_v43 }
  0xc2   : > { %v639_v63 = vmax.f32 %v561_v59, 0.0 }
  0xc3   : > { %v647_v59 = vmax.f32 %v581_v37, 0.0 }
  0xc4   : > { %v671_v10 = vadd.f32 %v639_v63, %v638_v3 }
  0xc5   : > { %v600_v44 = vpop.f32.mrf.mxu2 }
  0xc6   : > { %v1128_v45 = vpop.f32.mrf.mxu3  ;;  %v601_v1 = vadd.f32 %v1143_v57, %v600_v44 }
  0xc7   : > { %v563_v46 = vpop.f32.mrf.mxu0 }
  0xc8   : > { %v1130_v47 = vpop.f32.mrf.mxu1  ;;  %v564_v61 = vadd.f32 %v1143_v57, %v563_v46  ;;  %v655_v13 = vmax.f32 %v601_v1, 0.0  ;;  %v621_v1 = vadd.f32 %v1143_v57, %v1128_v45 }
  0xc9   : > { %v584_v39 = vadd.f32 %v1143_v57, %v1130_v47 }
  0xca   : > { %v640_v4 = vmax.f32 %v564_v61, 0.0  ;;  %v692_v23 = vadd.f32 %v655_v13, %v654_v18  ;;  %v663_v45 = vmax.f32 %v621_v1, 0.0 }
  0xcb   : > { %v648_v47 = vmax.f32 %v584_v39, 0.0 }
  0xcc   : > { %v672_v14 = vadd.f32 %v671_v10, %v640_v4 }
  0xcd   : > { %v603_v48 = vpop.f32.mrf.mxu2 }
  0xce   : > { %v1132_v50 = vpop.f32.mrf.mxu3  ;;  %v604_v7 = vadd.f32 %v1143_v57, %v603_v48 }
  0xcf   : > { %v565_v49 = vpop.f32.mrf.mxu0 }
  0xd0   : > { %v1134_v51 = vpop.f32.mrf.mxu1  ;;  %v566_v0 = vadd.f32 %v1143_v57, %v565_v49  ;;  %v656_v19 = vmax.f32 %v604_v7, 0.0  ;;  %v646_v49 = vmax.f32 %v579_v30, 0.0  ;;  %v624_v7 = vadd.f32 %v1143_v57, %v1132_v50 }
  0xd1   : > { %v586_v43 = vadd.f32 %v1143_v57, %v1134_v51 }
  0xd2   : > { %v641_v11 = vmax.f32 %v566_v0, 0.0  ;;  %v693_v31 = vadd.f32 %v692_v23, %v656_v19 }
  0xd4   : > { %v673_v21 = vadd.f32 %v672_v14, %v641_v11 }
  0xd5   : > { %v605_v52 = vpop.f32.mrf.mxu2 }
  0xd6   : > { %v1136_v54 = vpop.f32.mrf.mxu3  ;;  %v606_v15 = vadd.f32 %v1143_v57, %v605_v52 }
  0xd7   : > { %v568_v53 = vpop.f32.mrf.mxu0  ;;  %v626_v14 = vadd.f32 %v1143_v57, %v1136_v54 }
  0xd8   : > { %v1138_v56 = vpop.f32.mrf.mxu1  ;;  %v569_v5 = vadd.f32 %v1143_v57, %v568_v53  ;;  %v657_v26 = vmax.f32 %v606_v15, 0.0 }
  0xd9   : > { %v589_v3 = vadd.f32 %v1143_v57, %v1138_v56 }
  0xda   : > { %v642_v16 = vmax.f32 %v569_v5, 0.0  ;;  %v694_v42 = vadd.f32 %v693_v31, %v657_v26 }
  0xdb   : > { %v650_v56 = vmax.f32 %v589_v3, 0.0 }
  0xdc   : > { %v674_v27 = vadd.f32 %v673_v21, %v642_v16 }
  0xdd   : > { %v608_v55 = vpop.f32.mrf.mxu2 }
  0xde   : > { %v1148_v62 = vpop.f32.mrf.mxu3  ;;  %v609_v20 = vadd.f32 %v1143_v57, %v608_v55 }
  0xdf   : > { %v570_v58 = vpop.f32.mrf.mxu0  ;;  %v629_v18 = vadd.f32 %v1143_v57, %v1148_v62 }
  0xe0   : > { %v590_v9 = vpop.f32.mrf.mxu1  ;;  %v571_v12 = vadd.f32 %v1143_v57, %v570_v58  ;;  %v658_v32 = vmax.f32 %v609_v20, 0.0  ;;  %v619_v58 = vadd.f32 %v1143_v57, %v1126_v41 }
  0xe1   : > { %v591_v51 = vadd.f32 %v1143_v57, %v590_v9 }
  0xe2   : > { %v643_v22 = vmax.f32 %v571_v12, 0.0  ;;  %v695_v52 = vadd.f32 %v694_v42, %v658_v32  ;;  %v662_v6 = vmax.f32 %v619_v58, 0.0 }
  0xe3   : > { %v651_v50 = vmax.f32 %v591_v51, 0.0 }
  0xe4   : > { %v675_v34 = vadd.f32 %v674_v27, %v643_v22  ;;  %v665_v22 = vmax.f32 %v626_v14, 0.0  ;;  %v666_v27 = vmax.f32 %v629_v18, 0.0 }
  0xe5   : > { %v610_v2 = vpop.f32.mrf.mxu2 }
  0xe6   : > { %v630_v25 = vpop.f32.mrf.mxu3  ;;  %v611_v28 = vadd.f32 %v1143_v57, %v610_v2 }
  0xe7   : > { %v573_v8 = vpop.f32.mrf.mxu0  ;;  %v631_v23 = vadd.f32 %v1143_v57, %v630_v25 }
  0xe8   : > { %v574_v17 = vadd.f32 %v1143_v57, %v573_v8  ;;  %v593_v38 = vpop.f32.mrf.mxu1  ;;  %v659_v44 = vmax.f32 %v611_v28, 0.0  ;;  %v649_v8 = vmax.f32 %v586_v43, 0.0 }
  0xe9   : > { %v594_v11 = vadd.f32 %v1143_v57, %v593_v38  ;;  %v667_v32 = vmax.f32 %v631_v23, 0.0 }
  0xea   : > { %v644_v29 = vmax.f32 %v574_v17, 0.0  ;;  %v696_v61 = vadd.f32 %v695_v52, %v659_v44  ;;  %v664_v17 = vmax.f32 %v624_v7, 0.0 }
  0xeb   : > { %v652_v19 = vmax.f32 %v594_v11, 0.0 }
  0xec   : > { %v676_v46 = vadd.f32 %v675_v34, %v644_v29 }
  0xed   : > { %v613_v24 = vpop.f32.mrf.mxu2 }
  0xee   : > { %v614_v35 = vadd.f32 %v1143_v57, %v613_v24  ;;  %v633_v2 = vpop.f32.mrf.mxu3 }
  0xef   : > { %v575_v33 = vpop.f32.mrf.mxu0  ;;  %v634_v29 = vadd.f32 %v1143_v57, %v633_v2 }
  0xf0   : > { %v576_v36 = vadd.f32 %v1143_v57, %v575_v33  ;;  %v660_v53 = vmax.f32 %v614_v35, 0.0  ;;  %v595_v13 = vpop.f32.mrf.mxu1 }
  0xf1   : > { %v596_v21 = vadd.f32 %v1143_v57, %v595_v13  ;;  %v668_v35 = vmax.f32 %v634_v29, 0.0 }
  0xf2   : > { %v645_v48 = vmax.f32 %v576_v36, 0.0  ;;  %v697_v4 = vadd.f32 %v696_v61, %v660_v53 }
  0xf3   : > { %v653_v31 = vmax.f32 %v596_v21, 0.0 }
  0xf4   : > { %v677_v55 = vadd.f32 %v676_v46, %v645_v48 }
  0xf5   : > { %v615_v60 = vpop.f32.mrf.mxu2 }
  0xf6   : > { %v678_v63 = vadd.f32 %v677_v55, %v646_v49  ;;  %v616_v0 = vadd.f32 %v1143_v57, %v615_v60  ;;  %v635_v54 = vpop.f32.mrf.mxu3 }
  0xf7   : > { %v636_v34 = vadd.f32 %v1143_v57, %v635_v54  ;;  %v670_v57 = vld [vmem:[%s1165_s21] sm:$0x3] }
  0xf8   : > { %v679_v5 = vadd.f32 %v678_v63, %v647_v59  ;;  %v661_v41 = vmax.f32 %v616_v0, 0.0 }
  0xf9   : > { %v669_v40 = vmax.f32 %v636_v34, 0.0 }
  0xfa   : > { %v680_v10 = vadd.f32 %v679_v5, %v648_v47  ;;  %v698_v12 = vadd.f32 %v697_v4, %v661_v41 }
  0xfc   : > { %v681_v15 = vadd.f32 %v680_v10, %v649_v8  ;;  %v699_v16 = vadd.f32 %v698_v12, %v662_v6 }
  0xfe   : > { %v682_v9 = vadd.f32 %v681_v15, %v650_v56  ;;  %v700_v20 = vadd.f32 %v699_v16, %v663_v45 }
 0x100   : > { %v683_v24 = vadd.f32 %v682_v9, %v651_v50  ;;  %v701_v26 = vadd.f32 %v700_v20, %v664_v17 }
 0x102   : > { %v684_v28 = vadd.f32 %v683_v24, %v652_v19  ;;  %v702_v30 = vadd.f32 %v701_v26, %v665_v22 }
 0x104   : > { %v703_v62 = vadd.f32 %v702_v30, %v666_v27  ;;  %v685_v33 = vadd.f32 %v684_v28, %v653_v31 }
 0x106   : > { %v704_v36 = vadd.f32 %v703_v62, %v667_v32  ;;  %v686_v37 = vrot.slane %v685_v33, 4 }
 0x108   : > { %v705_v38 = vadd.f32 %v704_v36, %v668_v35  ;;  %v687_v25 = vadd.f32 %v686_v37, %v685_v33 }
 0x10a   : > { %v688_v42 = vrot.slane %v687_v25, 2  ;;  %v706_v44 = vadd.f32 %v705_v38, %v669_v40 }
 0x10c   : > { %v707_v46 = vrot.slane %v706_v44, 4  ;;  %v689_v48 = vadd.f32 %v688_v42, %v687_v25 }
 0x10e   : > { %v708_v39 = vadd.f32 %v707_v46, %v706_v44  ;;  %v690_v52 = vrot.slane %v689_v48, 1 }
 0x110   : > { %v709_v49 = vrot.slane %v708_v39, 2  ;;  %v691_v58 = vadd.f32 %v690_v52, %v689_v48 }
 0x112   : > { %v710_v53 = vadd.f32 %v709_v49, %v708_v39 }
 0x114   : > { %v711_v55 = vrot.slane %v710_v53, 1 }
 0x116   : > { %v712_v59 = vadd.f32 %v711_v55, %v710_v53 }
 0x118   : > { %v716_v60 = vsel %vm715_vm2, %v712_v59, %v691_v58 }
 0x119   : > { %v718_v43 = vadd.f32 %v716_v60, %v670_v57 }
 0x11b   : > { %719 = vst [vmem:[%s1165_s21] sm:$0x3] %v718_v43 }
 0x11c PF: > { %s13_s16 = sadd.s32 1, %s996_s16   ;;  %s1216_s12 = smov %s984_s13 }
 0x11d   : > { %p10_p10 = scmp.ge.s32.totalorder %s13_s16, 4   ;;  %s1217_s13 = smov %s1054_s20 }
 0x11e   : > { %s1218_s14 = smov %s992_s15  ;;  %s1219_s15 = smov %s1221_s17 }
 0x11f   :  { %12 = sbr.rel (!%p10_p10) target bundleno = 3 (0x3), region = 112 }

</bundles_post_ra>
